<compile_context>
chip_gen: v7x
topology: tpu7x:2x2x1
jax: 0.10.0
libtpu: 0.0.40
codegen_flags: <defaults>
</compile_context>

<pallas_src>
import jax
import jax.numpy as jnp
from jax.experimental import pallas as pl
from jax.experimental.pallas import tpu as pltpu

EPS = 1e-12      # F.normalize eps
BN_EPS = 1e-5    # BatchNorm2d eps


def make_netvlad_kernel(alpha):
    def netvlad_kernel(x_ref, wn_ref, wt_ref, b_ref, vlad_ref, sa_ref, loc_ref):
        # x_ref: (TB, S, C)   wn_ref: (C, K) pre-normalized   wt_ref: (K, C)
        # b_ref: (K, 1)
        # vlad_ref: (TB, K, C)   sa_ref: (TB, K, S)   loc_ref: (TB, S, C)
        tb, s, c = x_ref.shape
        k = wt_ref.shape[0]

        x = x_ref[...]

        # F.normalize(x, p=2, dim=channels): lane reduce + EUP rsqrt
        xn = x * jax.lax.rsqrt(
            jnp.maximum(jnp.sum(x * x, axis=-1, keepdims=True), EPS * EPS))
        loc_ref[...] = xn

        # soft_assign_ = xn @ normalize(W): one big MXU matmul over TB*S rows
        # (wn stays resident in the MXU across the whole block).
        sa = jnp.dot(xn.reshape(tb * s, c), wn_ref[...],
                     preferred_element_type=jnp.float32).reshape(tb, s, k)

        # module returns soft_assign_.permute(0, 2, 1): emit (TB, K, S) here.
        # NOTE: S=64 < 128 lanes in the test -> masked stores on sa only; sa is
        # ~10% of output bytes, accepted per review.
        saT = jnp.swapaxes(sa, 1, 2)                               # (TB, K, S)
        sa_ref[...] = saT

        # softmax over clusters in the (K, S) layout we already have
        logits = (saT + b_ref[...][None]) * alpha
        m = jnp.max(logits, axis=1, keepdims=True)
        e = jnp.exp(logits - m)
        # exact divide: alpha=50 amplifies soft-assign error; approx reciprocal
        # would eat into the 5e-4 tolerance budget.
        p = e / jnp.sum(e, axis=1, keepdims=True)                  # (TB, K, S)

        # vlad[b,k,c] = sum_s p[b,k,s] * (xn[b,s,c] - w[c,k])
        #            = (p @ xn)[b,k,c] - wT[k,c] * psum[b,k]
        # contraction over s = last dim of p, second dim of xn -> standard MXU
        # matmul (no compiler-inserted LHS transpose).
        agg = jnp.einsum('bks,bsc->bkc', p, xn,
                         preferred_element_type=jnp.float32)       # (TB, K, C)
        psum = jnp.sum(p, axis=-1, keepdims=True)                  # (TB, K, 1)
        vlad = agg - psum * wt_ref[...][None]                      # (TB, K, C)

        # intra-normalize over C
        ss = jnp.sum(vlad * vlad, axis=-1, keepdims=True)          # (TB, K, 1)
        vlad = vlad * jax.lax.rsqrt(jnp.maximum(ss, EPS * EPS))

        # global L2 over K*C from the per-row sums already in hand:
        #   ||row_after||^2 = ss / max(ss, eps^2) = min(ss/eps^2, 1)
        gsum = jnp.sum(jnp.minimum(ss * (1.0 / (EPS * EPS)), 1.0),
                       axis=1, keepdims=True)                      # (TB, 1, 1)
        vlad_ref[...] = vlad * jax.lax.rsqrt(jnp.maximum(gsum, EPS * EPS))

    return netvlad_kernel


def _per_batch_tile_bytes(s, c, k):
    # f32 tiles moved per batch element per grid step: x in + loc/vlad/sa out
    return 4 * (2 * s * c + k * c + k * s)


def _pick_tb(n, s, c, k, vmem_budget_bytes=12 << 20):
    """Size TB from a VMEM budget (double-buffered tiles), preferring an even
    grid with >=4 steps so v7x's two TensorCores each get >=2 steps."""
    per_tb = 2 * _per_batch_tile_bytes(s, c, k)   # double-buffered bytes / elem
    divisors = [d for d in range(1, n + 1) if n % d == 0]

    def candidates(min_steps, need_even):
        out = []
        for tb in divisors:
            steps = n // tb
            if tb * per_tb > vmem_budget_bytes:
                continue
            if steps < min_steps:
                continue
            if need_even and steps % 2 != 0:
                continue
            out.append(tb)
        return out

    for min_steps, need_even in ((4, True), (2, True), (2, False), (1, False)):
        cand = candidates(min_steps, need_even)
        if cand:
            return max(cand)
    return 1


def netvlad_cent_adap_forward(x_sc, weight, bias, num_clusters, alpha):
    """x_sc: (N, S, C) f32 features (C = lane dim); weight: (C, K); bias: (K,)."""
    N, S, C = x_sc.shape
    K = num_clusters
    tb = _pick_tb(N, S, C, K)

    # grid-invariant weight prep hoisted out of the kernel
    wn = weight * jax.lax.rsqrt(
        jnp.maximum(jnp.sum(weight * weight, axis=0, keepdims=True), EPS * EPS))
    wt = weight.T                                                  # (K, C)
    bias2 = bias.reshape(K, 1)

    # explicit VMEM limit matching the chosen TB (v5e scoped default is 16 MiB)
    dbuf = 2 * tb * _per_batch_tile_bytes(S, C, K)
    wbytes = 2 * 4 * (2 * C * K + K)
    vmem_limit = int(min(max(dbuf + wbytes + (2 << 20), 16 << 20), 32 << 20))

    vlad3, sa_ks, local = pl.pallas_call(
        make_netvlad_kernel(alpha),
        out_shape=(
            jax.ShapeDtypeStruct((N, K, C), jnp.float32),
            jax.ShapeDtypeStruct((N, K, S), jnp.float32),
            jax.ShapeDtypeStruct((N, S, C), jnp.float32),
        ),
        grid_spec=pltpu.PrefetchScalarGridSpec(
            num_scalar_prefetch=0,
            grid=(N // tb,),
            in_specs=[
                pl.BlockSpec((tb, S, C), lambda n: (n, 0, 0)),
                pl.BlockSpec((C, K), lambda n: (0, 0)),
                pl.BlockSpec((K, C), lambda n: (0, 0)),
                pl.BlockSpec((K, 1), lambda n: (0, 0)),
            ],
            out_specs=[
                pl.BlockSpec((tb, K, C), lambda n: (n, 0, 0)),
                pl.BlockSpec((tb, K, S), lambda n: (n, 0, 0)),
                pl.BlockSpec((tb, S, C), lambda n: (n, 0, 0)),
            ],
        ),
        compiler_params=pltpu.CompilerParams(
            dimension_semantics=("parallel",),
            vmem_limit_bytes=vmem_limit),
    )(x_sc, wn, wt, bias2)

    # C == lane width (128): the (K, C) store is already unmasked/lane-dense;
    # this reshape of contiguous trailing dims is free in XLA.
    vlad = vlad3.reshape(N, K * C)
    return vlad, sa_ks, local


def bottleneck_layer_2_nhwc(x_nchw, conv_w, gamma, beta, mean, var):
    """3x3 stride-2 conv with BatchNorm folded into the weights, ReLU epilogue.
    Emits NHWC so the NetVLAD wrapper only needs a free reshape to (N, S, C)."""
    # TODO(synk): the 3x3 stride-2 conv itself is lowered with XLA's
    # conv_general_dilated rather than a hand-written Pallas conv.
    scale = gamma * jax.lax.rsqrt(var + BN_EPS)
    w = conv_w * scale[:, None, None, None]            # OIHW: fold per out-chan
    b = beta - mean * scale
    y = jax.lax.conv_general_dilated(
        x_nchw, w, window_strides=(2, 2), padding=((1, 1), (1, 1)),
        dimension_numbers=('NCHW', 'OIHW', 'NHWC'),
        precision=jax.lax.Precision.HIGHEST)
    y = y + b[None, None, None, :]
    return jnp.maximum(y, 0.0)                         # (N, H', W', C)


def feature_embedder_maddg_forward(x, conv_w, bn_gamma, bn_beta, bn_mean,
                                   bn_var, vlad_weight, vlad_bias,
                                   num_clusters, alpha, norm_flag=True):
    del norm_flag  # unused by the reference module's forward
    feat = bottleneck_layer_2_nhwc(x, conv_w, bn_gamma, bn_beta, bn_mean, bn_var)
    N, HO, WO, C = feat.shape
    x_sc = feat.reshape(N, HO * WO, C)                 # free: contiguous dims
    return netvlad_cent_adap_forward(x_sc, vlad_weight, vlad_bias,
                                     num_clusters, alpha)


# ----------------------------- reference path ------------------------------

def init_netvlad_params(key, num_clusters, dim):
    """Mirror module init: orthogonal centroids (K, C); conv.weight = centroids.T."""
    a = jax.random.normal(key, (dim, num_clusters), jnp.float32)
    q, _ = jnp.linalg.qr(a)                   # (C, K), orthonormal columns
    weight = q                                # conv.weight (C, K)
    bias = jnp.zeros((num_clusters,), jnp.float32)
    return weight, bias


def bottleneck_layer_2_ref(x, conv_w, gamma, beta, mean, var):
    # independent NCHW path with unfolded BN, for verification only
    y = jax.lax.conv_general_dilated(
        x, conv_w, window_strides=(2, 2), padding=((1, 1), (1, 1)),
        dimension_numbers=('NCHW', 'OIHW', 'NCHW'),
        precision=jax.lax.Precision.HIGHEST)
    scale = (gamma * jax.lax.rsqrt(var + BN_EPS))[None, :, None, None]
    y = (y - mean[None, :, None, None]) * scale + beta[None, :, None, None]
    return jnp.maximum(y, 0.0)


def netvlad_ref(y, weight, bias, alpha):
    """Pure-JAX reference mirroring NetVLAD_cent_adap.forward exactly."""
    hp = jax.lax.Precision.HIGHEST
    N, C, _, _ = y.shape
    xn = y / jnp.maximum(jnp.linalg.norm(y, axis=1, keepdims=True), EPS)
    xf = xn.reshape(N, C, -1)                                      # (N, C, S)
    wn = weight / jnp.maximum(
        jnp.linalg.norm(weight, axis=0, keepdims=True), EPS)
    sa_ = jnp.einsum('ncs,ck->nsk', xf, wn, precision=hp)          # (N, S, K)
    p = jax.nn.softmax((sa_ + bias) * alpha, axis=-1)              # (N, S, K)
    res = xf[:, None, :, :] - weight.T[None, :, :, None]           # (N, K, C, S)
    res = res * jnp.transpose(p, (0, 2, 1))[:, :, None, :]
    vlad = res.sum(-1)                                             # (N, K, C)
    vlad = vlad / jnp.maximum(
        jnp.linalg.norm(vlad, axis=2, keepdims=True), EPS)
    vlad = vlad.reshape(N, -1)
    vlad = vlad / jnp.maximum(
        jnp.linalg.norm(vlad, axis=1, keepdims=True), EPS)
    return vlad, jnp.transpose(sa_, (0, 2, 1)), jnp.transpose(xf, (0, 2, 1))


def ref_forward(x, conv_w, bn_gamma, bn_beta, bn_mean, bn_var,
                vlad_weight, vlad_bias, alpha):
    y = bottleneck_layer_2_ref(x, conv_w, bn_gamma, bn_beta, bn_mean, bn_var)
    return netvlad_ref(y, vlad_weight, vlad_bias, alpha)


if __name__ == "__main__":
    key = jax.random.PRNGKey(0)
    k_x, k_cw, k_bn, k_vl = jax.random.split(key, 4)

    # small shapes consistent with the module (128-ch bottleneck, small HxW)
    N, CIN, H, W = 2, 128, 16, 16
    K = 16                    # num_clusters (module default 64; small test)
    DIM = 128                 # netvlad dim == bottleneck output channels
    ALPHA = 50.0

    x = jax.random.normal(k_x, (N, CIN, H, W), jnp.float32)

    conv_w = 0.05 * jax.random.normal(k_cw, (128, 128, 3, 3), jnp.float32)
    kb1, kb2, kb3, kb4 = jax.random.split(k_bn, 4)
    bn_gamma = 1.0 + 0.1 * jax.random.normal(kb1, (128,), jnp.float32)
    bn_beta = 0.1 * jax.random.normal(kb2, (128,), jnp.float32)
    bn_mean = 0.1 * jax.random.normal(kb3, (128,), jnp.float32)
    bn_var = 1.0 + 0.1 * jnp.abs(jax.random.normal(kb4, (128,), jnp.float32))

    vlad_w, vlad_b = init_netvlad_params(k_vl, K, DIM)

    feat, sa, local = feature_embedder_maddg_forward(
        x, conv_w, bn_gamma, bn_beta, bn_mean, bn_var, vlad_w, vlad_b,
        K, ALPHA, norm_flag=True)
    jax.block_until_ready((feat, sa, local))

    feat_r, sa_r, local_r = ref_forward(
        x, conv_w, bn_gamma, bn_beta, bn_mean, bn_var, vlad_w, vlad_b, ALPHA)

    HO = (H + 2 - 3) // 2 + 1
    WO = (W + 2 - 3) // 2 + 1
    S = HO * WO
    assert feat.shape == (N, K * DIM)
    assert sa.shape == (N, K, S)
    assert local.shape == (N, S, DIM)
    assert jnp.allclose(feat, feat_r, atol=5e-4, rtol=5e-4), "vlad mismatch"
    assert jnp.allclose(sa, sa_r, atol=5e-4, rtol=5e-4), "soft_assign mismatch"
    assert jnp.allclose(local, local_r, atol=1e-4, rtol=1e-4), "local mismatch"

    print("KERNEL_OK")
</pallas_src>

<mosaic_0001>
module attributes {stable_mosaic.version = 11 : i64} {
  func.func @netvlad_kernel(%arg0: i32, %arg1: memref<1x64x128xf32, #tpu.memory_space<vmem>>, %arg2: memref<128x16xf32, #tpu.memory_space<vmem>>, %arg3: memref<16x128xf32, #tpu.memory_space<vmem>>, %arg4: memref<16x1xf32, #tpu.memory_space<vmem>>, %arg5: memref<1x16x128xf32, #tpu.memory_space<vmem>>, %arg6: memref<1x16x64xf32, #tpu.memory_space<vmem>>, %arg7: memref<1x64x128xf32, #tpu.memory_space<vmem>>) attributes {dimension_semantics = [#tpu.dimension_semantics<parallel>], iteration_bounds = array<i64: 2>, scalar_prefetch = 0 : i64, scratch_operands = 0 : i64, tpu.core_type = #tpu.core_type<tc>, window_params = [{transform_indices = @transform_0, window_bounds = array<i64: 1, 64, 128>}, {pipeline_mode = #tpu.pipeline_mode<synchronous>, transform_indices = @transform_1, window_bounds = array<i64: 128, 16>}, {pipeline_mode = #tpu.pipeline_mode<synchronous>, transform_indices = @transform_2, window_bounds = array<i64: 16, 128>}, {pipeline_mode = #tpu.pipeline_mode<synchronous>, transform_indices = @transform_3, window_bounds = array<i64: 16, 1>}, {transform_indices = @transform_4, window_bounds = array<i64: 1, 16, 128>}, {transform_indices = @transform_5, window_bounds = array<i64: 1, 16, 64>}, {transform_indices = @transform_6, window_bounds = array<i64: 1, 64, 128>}]} {
    %c0 = arith.constant 0 : index
    %c0_0 = arith.constant 0 : index
    %c0_1 = arith.constant 0 : index
    %0 = vector.load %arg1[%c0, %c0_0, %c0_1] : memref<1x64x128xf32, #tpu.memory_space<vmem>>, vector<1x64x128xf32>
    %1 = arith.mulf %0, %0 : vector<1x64x128xf32>
    %cst = arith.constant dense<0.000000e+00> : vector<1x64xf32>
    %2 = vector.multi_reduction <add>, %1, %cst [2] : vector<1x64x128xf32> to vector<1x64xf32>
    %3 = vector.shape_cast %2 : vector<1x64xf32> to vector<1x64x1xf32>
    %cst_2 = arith.constant 1.000000e-24 : f32
    %4 = vector.broadcast %cst_2 : f32 to vector<1x64x1xf32>
    %5 = arith.maximumf %3, %4 : vector<1x64x1xf32>
    %6 = math.rsqrt %5 : vector<1x64x1xf32>
    %7 = vector.broadcast %6 : vector<1x64x1xf32> to vector<1x64x128xf32>
    %8 = arith.mulf %0, %7 : vector<1x64x128xf32>
    %c0_3 = arith.constant 0 : index
    %c0_4 = arith.constant 0 : index
    %c0_5 = arith.constant 0 : index
    %9 = vector.load %arg7[%c0_3, %c0_4, %c0_5] : memref<1x64x128xf32, #tpu.memory_space<vmem>>, vector<1x64x128xf32>
    tpu.vector_store %arg7[%c0_3, %c0_4, %c0_5], %8 {strides = array<i32>} : memref<1x64x128xf32, #tpu.memory_space<vmem>>, vector<1x64x128xf32>,
    %10 = vector.shape_cast %8 : vector<1x64x128xf32> to vector<64x128xf32>
    %c0_6 = arith.constant 0 : index
    %c0_7 = arith.constant 0 : index
    %11 = vector.load %arg2[%c0_6, %c0_7] : memref<128x16xf32, #tpu.memory_space<vmem>>, vector<128x16xf32>
    %cst_8 = arith.constant dense<0.000000e+00> : vector<64x16xf32>
    %12 = tpu.matmul %10, %11, %cst_8 {dimension_numbers = #tpu.dot_dimension_numbers<[1], [0], [0], [1], [0, 0, 1, 1], [], []>} : vector<64x128xf32>, vector<128x16xf32>, vector<64x16xf32> -> vector<64x16xf32>
    %13 = vector.shape_cast %12 : vector<64x16xf32> to vector<1x64x16xf32>
    %14 = tpu.transpose %13, [0, 2, 1] : vector<1x64x16xf32> -> vector<1x16x64xf32>
    %c0_9 = arith.constant 0 : index
    %c0_10 = arith.constant 0 : index
    %c0_11 = arith.constant 0 : index
    %15 = vector.load %arg6[%c0_9, %c0_10, %c0_11] : memref<1x16x64xf32, #tpu.memory_space<vmem>>, vector<1x16x64xf32>
    tpu.vector_store %arg6[%c0_9, %c0_10, %c0_11], %14 {strides = array<i32>} : memref<1x16x64xf32, #tpu.memory_space<vmem>>, vector<1x16x64xf32>,
    %c0_12 = arith.constant 0 : index
    %c0_13 = arith.constant 0 : index
    %16 = vector.load %arg4[%c0_12, %c0_13] : memref<16x1xf32, #tpu.memory_space<vmem>>, vector<16x1xf32>
    %17 = vector.shape_cast %16 : vector<16x1xf32> to vector<1x16x1xf32>
    %18 = vector.broadcast %17 : vector<1x16x1xf32> to vector<1x16x64xf32>
    %19 = arith.addf %14, %18 : vector<1x16x64xf32>
    %cst_14 = arith.constant 5.000000e+01 : f32
    %20 = vector.broadcast %cst_14 : f32 to vector<1x16x64xf32>
    %21 = arith.mulf %19, %20 : vector<1x16x64xf32>
    %cst_15 = arith.constant dense<0xFF800000> : vector<1x64xf32>
    %22 = vector.multi_reduction <maximumf>, %21, %cst_15 [1] : vector<1x16x64xf32> to vector<1x64xf32>
    %23 = vector.shape_cast %22 : vector<1x64xf32> to vector<1x1x64xf32>
    %24 = vector.broadcast %23 : vector<1x1x64xf32> to vector<1x16x64xf32>
    %25 = arith.subf %21, %24 : vector<1x16x64xf32>
    %26 = math.exp %25 : vector<1x16x64xf32>
    %cst_16 = arith.constant dense<0.000000e+00> : vector<1x64xf32>
    %27 = vector.multi_reduction <add>, %26, %cst_16 [1] : vector<1x16x64xf32> to vector<1x64xf32>
    %28 = vector.shape_cast %27 : vector<1x64xf32> to vector<1x1x64xf32>
    %29 = vector.broadcast %28 : vector<1x1x64xf32> to vector<1x16x64xf32>
    %30 = arith.divf %26, %29 : vector<1x16x64xf32>
    "tpu.trace_start"() <{level = 10 : i32, message = "bks,bsc->bkc"}> : () -> ()
    %cst_17 = arith.constant dense<0.000000e+00> : vector<1x16x128xf32>
    %31 = tpu.matmul %30, %8, %cst_17 {dimension_numbers = #tpu.dot_dimension_numbers<[2], [1], [1], [2], [0, 0, 0, 1, 1, 2], [0], [0]>} : vector<1x16x64xf32>, vector<1x64x128xf32>, vector<1x16x128xf32> -> vector<1x16x128xf32>
    "tpu.trace_stop"() : () -> ()
    %cst_18 = arith.constant dense<0.000000e+00> : vector<1x16xf32>
    %32 = vector.multi_reduction <add>, %30, %cst_18 [2] : vector<1x16x64xf32> to vector<1x16xf32>
    %33 = vector.shape_cast %32 : vector<1x16xf32> to vector<1x16x1xf32>
    %c0_19 = arith.constant 0 : index
    %c0_20 = arith.constant 0 : index
    %34 = vector.load %arg3[%c0_19, %c0_20] : memref<16x128xf32, #tpu.memory_space<vmem>>, vector<16x128xf32>
    %35 = vector.shape_cast %34 : vector<16x128xf32> to vector<1x16x128xf32>
    %36 = vector.broadcast %33 : vector<1x16x1xf32> to vector<1x16x128xf32>
    %37 = arith.mulf %36, %35 : vector<1x16x128xf32>
    %38 = arith.subf %31, %37 : vector<1x16x128xf32>
    %39 = arith.mulf %38, %38 : vector<1x16x128xf32>
    %cst_21 = arith.constant dense<0.000000e+00> : vector<1x16xf32>
    %40 = vector.multi_reduction <add>, %39, %cst_21 [2] : vector<1x16x128xf32> to vector<1x16xf32>
    %41 = vector.shape_cast %40 : vector<1x16xf32> to vector<1x16x1xf32>
    %cst_22 = arith.constant 1.000000e-24 : f32
    %42 = vector.broadcast %cst_22 : f32 to vector<1x16x1xf32>
    %43 = arith.maximumf %41, %42 : vector<1x16x1xf32>
    %44 = math.rsqrt %43 : vector<1x16x1xf32>
    %45 = vector.broadcast %44 : vector<1x16x1xf32> to vector<1x16x128xf32>
    %46 = arith.mulf %38, %45 : vector<1x16x128xf32>
    %cst_23 = arith.constant 1.000000e+24 : f32
    %47 = vector.broadcast %cst_23 : f32 to vector<1x16x1xf32>
    %48 = arith.mulf %41, %47 : vector<1x16x1xf32>
    %cst_24 = arith.constant 1.000000e+00 : f32
    %49 = vector.broadcast %cst_24 : f32 to vector<1x16x1xf32>
    %50 = arith.minimumf %48, %49 : vector<1x16x1xf32>
    %cst_25 = arith.constant dense<0.000000e+00> : vector<1x1xf32>
    %51 = vector.multi_reduction <add>, %50, %cst_25 [1] : vector<1x16x1xf32> to vector<1x1xf32>
    %52 = vector.shape_cast %51 : vector<1x1xf32> to vector<1x1x1xf32>
    %cst_26 = arith.constant 1.000000e-24 : f32
    %53 = vector.broadcast %cst_26 : f32 to vector<1x1x1xf32>
    %54 = arith.maximumf %52, %53 : vector<1x1x1xf32>
    %55 = math.rsqrt %54 : vector<1x1x1xf32>
    %56 = vector.broadcast %55 : vector<1x1x1xf32> to vector<1x16x128xf32>
    %57 = arith.mulf %46, %56 : vector<1x16x128xf32>
    %c0_27 = arith.constant 0 : index
    %c0_28 = arith.constant 0 : index
    %c0_29 = arith.constant 0 : index
    %58 = vector.load %arg5[%c0_27, %c0_28, %c0_29] : memref<1x16x128xf32, #tpu.memory_space<vmem>>, vector<1x16x128xf32>
    tpu.vector_store %arg5[%c0_27, %c0_28, %c0_29], %57 {strides = array<i32>} : memref<1x16x128xf32, #tpu.memory_space<vmem>>, vector<1x16x128xf32>,
    return
  }
  func.func @transform_0(%arg0: i32) -> (i32, i32, i32) {
    %c0_i32 = arith.constant 0 : i32
    %c0_i32_0 = arith.constant 0 : i32
    %c0_i32_1 = arith.constant 0 : i32
    return %arg0, %c0_i32, %c0_i32_0 : i32, i32, i32
  }
  func.func @transform_1(%arg0: i32) -> (i32, i32) {
    %c0_i32 = arith.constant 0 : i32
    %c0_i32_0 = arith.constant 0 : i32
    %c0_i32_1 = arith.constant 0 : i32
    return %c0_i32, %c0_i32_0 : i32, i32
  }
  func.func @transform_2(%arg0: i32) -> (i32, i32) {
    %c0_i32 = arith.constant 0 : i32
    %c0_i32_0 = arith.constant 0 : i32
    %c0_i32_1 = arith.constant 0 : i32
    return %c0_i32, %c0_i32_0 : i32, i32
  }
  func.func @transform_3(%arg0: i32) -> (i32, i32) {
    %c0_i32 = arith.constant 0 : i32
    %c0_i32_0 = arith.constant 0 : i32
    %c0_i32_1 = arith.constant 0 : i32
    return %c0_i32, %c0_i32_0 : i32, i32
  }
  func.func @transform_4(%arg0: i32) -> (i32, i32, i32) {
    %c0_i32 = arith.constant 0 : i32
    %c0_i32_0 = arith.constant 0 : i32
    %c0_i32_1 = arith.constant 0 : i32
    return %arg0, %c0_i32, %c0_i32_0 : i32, i32, i32
  }
  func.func @transform_5(%arg0: i32) -> (i32, i32, i32) {
    %c0_i32 = arith.constant 0 : i32
    %c0_i32_0 = arith.constant 0 : i32
    %c0_i32_1 = arith.constant 0 : i32
    return %arg0, %c0_i32, %c0_i32_0 : i32, i32, i32
  }
  func.func @transform_6(%arg0: i32) -> (i32, i32, i32) {
    %c0_i32 = arith.constant 0 : i32
    %c0_i32_0 = arith.constant 0 : i32
    %c0_i32_1 = arith.constant 0 : i32
    return %arg0, %c0_i32, %c0_i32_0 : i32, i32, i32
  }
}

</mosaic_0001>

<bundles_post_ra>
// kernel: tpu_custom_call.1
= control target key start
LH: loop header
LB: loop body
LE: loop exit
PB: predicated region body
PF: predicated region fallthrough
CT: control target
= control target key end

     0   :  { %12 = vsyncpa [#allocation3], 0  ;;  %s1577_s0 = inlined_call_operand.vmem [shape: f32[2,64,128], index: 0, kind: input, shape index: {}]   ;;  %s1578_s1 = inlined_call_operand.vmem [shape: f32[128,16], index: 1, kind: input, shape index: {}]   ;;  %s1579_s2 = inlined_call_operand.vmem [shape: f32[16,128], index: 2, kind: input, shape index: {}]   ;;  %s1580_s3 = inlined_call_operand.vmem [shape: f32[16,1], index: 3, kind: input, shape index: {}]   ;;  %s1581_s4 = inlined_call_operand.hbm [shape: f32[2,16,128], index: 4, kind: output, shape index: {0}]   ;;  %s1582_s5 = inlined_call_operand.hbm [shape: f32[2,16,64], index: 5, kind: output, shape index: {1}]   ;;  %s1583_s6 = inlined_call_operand.hbm [shape: f32[2,64,128], index: 6, kind: output, shape index: {2}]  }
   0x1   :  { %14 = vsyncpa [#allocation3 + $0x1], 0 }
   0x2   :  { %15 = vsyncpa [#allocation5], 0 }
   0x3   :  { %17 = vsyncpa [#allocation5 + $0x1], 0  ;;  %s1251_s21 = smov 0   ;;  %s1253_s22 = smov 0  }
   0x4   :  { %s1255_s23 = smov 0   ;;  %s1257_s24 = smov 0  }
   0x5 LB: > { %s1272_s25 = sadd.s32 4294967295, %s1208_s24   ;;  %s1584_s26 = sadd.s32 4294967294, %s1208_s24   ;;  %s1208_s24 = sphi %s1257_s24, %s1595_s24   ;;  %s1204_s23 = sphi %s1255_s23, %s1594_s23   ;;  %s1200_s22 = sphi %s1253_s22, %s1593_s22   ;;  %s1196_s21 = sphi %s1251_s21, %s1592_s21  }
   0x6   : > { %s1276_s27 = sadd.s32 1, %s1208_s24   ;;  %s119_s28 = sadd.s32 1, %s1204_s23 }
   0x7   : > { %s116_s29 = ssub.s32 %s1208_s24, %s1276_s27  ;;  %p129_p0 = scmp.ne.s32.totalorder %s1204_s23, %s1200_s22 }
   0x8   : > { %p117_p1 = scmp.eq.s32.totalorder %s116_s29, 0  ;;  %p130_p2 = scmp.eq.s32.totalorder %s1272_s25, 1 }
   0x9   : > { %p135_p3 = scmp.ne.s32.totalorder %s1200_s22, %s1196_s21  ;;  %p136_p4 = scmp.eq.s32.totalorder %s1584_s26, 1 }
   0xa   : > { %s1289_s30 = scalar_select %p117_p1, %s1204_s23, %s119_s28  }
   0xb   : > { %p1291_p5 = por %p130_p2, %p129_p0  ;;  %p1295_p6 = por %p136_p4, %p135_p3 }
   0xc   : > { %p835_p7 = scmp.ge.s32.totalorder %s1208_s24, 1  ;;  %p223_p8 = scmp.lt.s32.totalorder %s1208_s24, 3 }
   0xe   : > { %p224_p9 = pnand %p835_p7, %p223_p8 }
   0xf   : > { %p263_p10 = scmp.lt.s32.totalorder (!%p224_p9), %s1272_s25, 1  ;;  %v332_v0 = vld [vmem:[%s1578_s1] sm:$0xff] (!%p224_p9)  ;;  %v333_v1 = vld [vmem:[%s1578_s1 + $0x8] sm:$0xff] (!%p224_p9)  ;;  %v334_v2 = vld [vmem:[%s1578_s1 + $0x10] sm:$0xff] (!%p224_p9)  ;;  %v1210_v41 = vmov (!%p224_p9), 0   ;;  %s1390_s20 = sand.u32 (!%p224_p9), 1, %s1200_s22  }
  0x10   : > { %227 = sbr.rel (%p224_p9) target bundleno = 1011 (0x3f3), region = 36  ;;  %v955_v3 = vpack.c.bf16 (!%p224_p9), %v333_v1, %v332_v0  ;;  %v335_v4 = vld [vmem:[%s1578_s1 + $0x18] sm:$0xff] (!%p224_p9)  ;;  %v336_v6 = vld [vmem:[%s1578_s1 + $0x20] sm:$0xff] (!%p224_p9)  ;;  %v337_v7 = vld [vmem:[%s1578_s1 + $0x28] sm:$0xff] (!%p224_p9)  ;;  %1057 = vset.pattern.permute.xlu1 (!%p224_p9), %v1210_v41  ;;  %1056 = vset.pattern.permute.xlu0 (!%p224_p9), %v1210_v41  ;;  %s838_s28 = sshll.u32 (!%p224_p9), %s1390_s20, 6  ;;  %vm485_vm0 = vcmask (!%p224_p9), 523264  }
  0x11   : > { %v959_v5 = vpack.c.bf16 (!%p224_p9), %v335_v4, %v334_v2  ;;  %v963_v11 = vpack.c.bf16 (!%p224_p9), %v337_v7, %v336_v6  ;;  %v338_v15 = vld [vmem:[%s1578_s1 + $0x30] sm:$0xff] (!%p224_p9)  ;;  %v339_v16 = vld [vmem:[%s1578_s1 + $0x38] sm:$0xff] (!%p224_p9)  ;;  %v340_v28 = vld [vmem:[%s1578_s1 + $0x40] sm:$0xff] (!%p224_p9)  ;;  %s658_s18 = sand.u32 (!%p224_p9), 1, %s1272_s25   ;;  %s1585_s19 = sshll.u32 (!%p224_p9), %s1272_s25, 8 }
  0x12   : > { %956 = vmatprep.subr.bf16.mxu0 (!%p224_p9), %v955_v3  ;;  %v967_v21 = vpack.c.bf16 (!%p224_p9), %v339_v16, %v338_v15  ;;  %v341_v29 = vld [vmem:[%s1578_s1 + $0x48] sm:$0xff] (!%p224_p9)  ;;  %v342_v31 = vld [vmem:[%s1578_s1 + $0x50] sm:$0xff] (!%p224_p9)  ;;  %v343_v32 = vld [vmem:[%s1578_s1 + $0x58] sm:$0xff] (!%p224_p9)  ;;  %s1455_s10 = scalar_lea.hbm (!%p224_p9), %s1582_s5, %s1585_s19  ;;  %s1457_s13 = scalar_lea.sflag (!%p224_p9), [#allocation5], %s658_s18 }
  0x13   : > { %958 = vmatpush3.bf16.msra.mxu0 (!%p224_p9), %v955_v3  ;;  %v971_v30 = vpack.c.bf16 (!%p224_p9), %v341_v29, %v340_v28  ;;  %v975_v33 = vpack.c.bf16 (!%p224_p9), %v343_v32, %v342_v31  ;;  %v344_v34 = vld [vmem:[%s1578_s1 + $0x60] sm:$0xff] (!%p224_p9)  ;;  %v345_v35 = vld [vmem:[%s1578_s1 + $0x68] sm:$0xff] (!%p224_p9)  ;;  %v346_v36 = vld [vmem:[%s1578_s1 + $0x70] sm:$0xff] (!%p224_p9) }
  0x14   : > { %960 = vmatprep.subr.bf16.mxu0 (!%p224_p9), %v959_v5  ;;  %v979_v37 = vpack.c.bf16 (!%p224_p9), %v345_v35, %v344_v34  ;;  %v347_v38 = vld [vmem:[%s1578_s1 + $0x78] sm:$0xff] (!%p224_p9)  ;;  %v489_v40 = vld [vmem:[%s1580_s3 + $0x8] sm:$0xff] (!%p224_p9) }
  0x15   : > { %v983_v39 = vpack.c.bf16 (!%p224_p9), %v347_v38, %v346_v36 }
  0x17   : > { %s264_s17 = scalar_select %p263_p10, %s1272_s25, 1  ;;  %962 = vmatpush3.bf16.msra.mxu0 %v959_v5 }
  0x18   : > { %964 = vmatprep.subr.bf16.mxu0 %v963_v11 }
  0x19   : > { %s854_s29 = sshll.u32 %s264_s17, 6 }
  0x1a   : > { %s267_s11 = scalar_lea.vmem %s1577_s0, %s854_s29  ;;  %s1395_s29 = scalar_lea.vmem [#allocation6], %s838_s28 }
  0x1b   : > { %v1324_v8 = vld [vmem:[%s267_s11] sm:$0xff]  ;;  %v1326_v9 = vld [vmem:[%s267_s11 + $0x10] sm:$0xff]  ;;  %v1328_v10 = vld [vmem:[%s267_s11 + $0x8] sm:$0xff]  ;;  %966 = vmatpush3.bf16.msra.mxu0 %v963_v11 }
  0x1c   : > { %v276_v12 = vmul.f32 %v1324_v8, %v1324_v8  ;;  %v278_v13 = vmul.f32 %v1326_v9, %v1326_v9  ;;  %v1334_v14 = vld [vmem:[%s267_s11 + $0x18] sm:$0xff]  ;;  %v277_v17 = vmul.f32 %v1328_v10, %v1328_v10  ;;  %v1346_v19 = vld [vmem:[%s267_s11 + $0x28] sm:$0xff]  ;;  %v1348_v20 = vld [vmem:[%s267_s11 + $0x20] sm:$0xff]  ;;  %968 = vmatprep.subr.bf16.mxu0 %v967_v21 }
  0x1d   : > { %v279_v18 = vmul.f32 %v1334_v14, %v1334_v14  ;;  %v281_v22 = vmul.f32 %v1346_v19, %v1346_v19  ;;  %v280_v23 = vmul.f32 %v1348_v20, %v1348_v20  ;;  %v1354_v24 = vld [vmem:[%s267_s11 + $0x38] sm:$0xff]  ;;  %v1356_v25 = vld [vmem:[%s267_s11 + $0x30] sm:$0xff]  ;;  %s1586_s11 = sshll.u32 %s1390_s20, 4 }
  0x1e   : > { %284 = vadd.xlane.f32.xlu0 %v276_v12  ;;  %288 = vadd.xlane.f32.xlu1 %v278_v13  ;;  %v283_v26 = vmul.f32 %v1354_v24, %v1354_v24  ;;  %v282_v27 = vmul.f32 %v1356_v25, %v1356_v25  ;;  %s1417_s12 = scalar_lea.vmem [#allocation4], %s1586_s11 }
  0x1f   : > { %970 = vmatpush3.bf16.msra.mxu0 %v967_v21  ;;  %s693_s17 = sshll.u32 %s1417_s12, 4  ;;  %s1446_s17 = int_to_ptr.vmem [resolvable:$true] %s693_s17 }
  0x20   : > { %972 = vmatprep.subr.bf16.mxu0 %v971_v30  ;;  %s1086_s14 = scalar_lea.vmem %s1446_s17, 256 }
  0x21   : > { %p1087_p11 = scmp.ne.s32.totalorder %s1446_s17, %s1086_s14 }
  0x22   : > { %286 = vadd.xlane.f32.xlu0 %v277_v17  ;;  %290 = vadd.xlane.f32.xlu1 %v279_v18 }
  0x23   : > { %974 = vmatpush3.bf16.msra.mxu0 %v971_v30  ;;  %p1088_p12 = pnand %p1087_p11, %p1291_p5 }
  0x24   : > { %976 = vmatprep.subr.bf16.mxu0 %v975_v33 }
  0x25   : > { %p1089_p13 = pneg %p1088_p12 }
  0x26   : > { %294 = vadd.xlane.f32.xlu1 %v281_v22  ;;  %292 = vadd.xlane.f32.xlu0 %v280_v23 }
  0x27   : > { %978 = vmatpush3.bf16.msra.mxu0 %v975_v33 }
  0x28   : > { %980 = vmatprep.subr.bf16.mxu0 %v979_v37 }
  0x2a   : > { %298 = vadd.xlane.f32.xlu1 %v283_v26  ;;  %296 = vadd.xlane.f32.xlu0 %v282_v27 }
  0x2b   : > { %982 = vmatpush3.bf16.msra.mxu0 %v979_v37 }
  0x2c   : > { %984 = vmatprep.subr.bf16.mxu0 %v983_v39 }
  0x2f   : > { %986 = vmatpush3.bf16.msra.mxu0 %v983_v39 }
  0x3b   : > { %497 = vperm.xlu1 %1057, %v489_v40  }
  0xab   : > { %v285_v42 = vpop.xlane.xlu0 %284  ;;  %v289_v43 = vpop.xlane.xlu1 %288 }
  0xac   : > { %v300_v44 = vmax.f32 %v285_v42, 1e-24  ;;  %v302_v45 = vmax.f32 %v289_v43, 1e-24 }
  0xae   : > { %1058 = vrsqrt.f32 %v300_v44 }
  0xaf   : > { %1060 = vrsqrt.f32 %v302_v45  ;;  %v287_v46 = vpop.xlane.xlu0 %286  ;;  %v291_v47 = vpop.xlane.xlu1 %290 }
  0xb0   : > { %v301_v48 = vmax.f32 %v287_v46, 1e-24  ;;  %v303_v49 = vmax.f32 %v291_v47, 1e-24 }
  0xb2   : > { %1062 = vrsqrt.f32 %v301_v48 }
  0xb3   : > { %1064 = vrsqrt.f32 %v303_v49  ;;  %v295_v50 = vpop.xlane.xlu1 %294  ;;  %v293_v51 = vpop.xlane.xlu0 %292 }
  0xb4   : > { %v305_v52 = vmax.f32 %v295_v50, 1e-24  ;;  %v304_v53 = vmax.f32 %v293_v51, 1e-24 }
  0xb6   : > { %1066 = vrsqrt.f32 %v305_v52 }
  0xb7   : > { %1068 = vrsqrt.f32 %v304_v53  ;;  %v299_v54 = vpop.xlane.xlu1 %298  ;;  %v297_v55 = vpop.xlane.xlu0 %296 }
  0xb8   : > { %v1059_v56 = vpop.eup %1058  ;;  %v307_v57 = vmax.f32 %v299_v54, 1e-24  ;;  %v306_v58 = vmax.f32 %v297_v55, 1e-24 }
  0xb9   : > { %v1061_v59 = vpop.eup %1060  ;;  %v316_v60 = vmul.f32 %v1059_v56, %v1324_v8 }
  0xba   : > { %v318_v61 = vmul.f32 %v1061_v59, %v1326_v9  ;;  %1070 = vrsqrt.f32 %v307_v57 }
  0xbb   : > { %924 = vmatprep.mubr.f32.mxu0 %v316_v60  ;;  %1072 = vrsqrt.f32 %v306_v58  ;;  %324 = vst [vmem:[%s1395_s29] sm:$0xff] %v316_v60  ;;  %v498_v23 = vpop.permute.xlu1 %497 }
  0xbc   : > { %v1063_v62 = vpop.eup %1062  ;;  %326 = vst [vmem:[%s1395_s29 + $0x10] sm:$0xff] %v318_v61 }
  0xbd   : > { %v1065_v63 = vpop.eup %1064  ;;  %v317_v0 = vmul.f32 %v1063_v62, %v1328_v10  ;;  %v619_v62 = vld [vmem:[%s1579_s2 + $0x8] sm:$0xff] }
  0xbe   : > { %v319_v1 = vmul.f32 %v1065_v63, %v1334_v14  ;;  %v488_v14 = vld [vmem:[%s1580_s3] sm:$0xff] }
  0xbf   : > { %925 = vmatmul.mubr.f32.vlgmr.msra.gmra.mrb[0].mxu0 %v317_v0  ;;  %v987_v2 = vpack.c.bf16 %v317_v0, %v316_v60  ;;  %325 = vst [vmem:[%s1395_s29 + $0x8] sm:$0xff] %v317_v0  ;;  %492 = vperm.xlu0 %1056, %v488_v14  }
  0xc0   : > { %v1067_v3 = vpop.eup %1066  ;;  %927 = vmatprep.mubr.f32.mxu0 %v318_v61  ;;  %v991_v4 = vpack.c.bf16 %v319_v1, %v318_v61  ;;  %327 = vst [vmem:[%s1395_s29 + $0x18] sm:$0xff] %v319_v1  ;;  %v618_v61 = vld [vmem:[%s1579_s2] sm:$0xff] }
  0xc1   : > { %v1069_v5 = vpop.eup %1068  ;;  %988 = vmatprep.subr.bf16.mxu1 %v987_v2  ;;  %v321_v6 = vmul.f32 %v1067_v3, %v1346_v19 }
  0xc2   : > { %990 = vmatpush3.bf16.msra.mxu1 %v987_v2  ;;  %v320_v7 = vmul.f32 %v1069_v5, %v1348_v20 }
  0xc3   : > { %992 = vmatprep.subr.bf16.mxu1 %v991_v4  ;;  %928 = vmatmul.mubr.f32.gmra.mrb[2].mxu0 %v319_v1  ;;  %329 = vst [vmem:[%s1395_s29 + $0x28] sm:$0xff] %v321_v6 }
  0xc4   : > { %v1071_v8 = vpop.eup %1070  ;;  %930 = vmatprep.mubr.f32.mxu0 %v320_v7  ;;  %v995_v9 = vpack.c.bf16 %v321_v6, %v320_v7  ;;  %328 = vst [vmem:[%s1395_s29 + $0x20] sm:$0xff] %v320_v7 }
  0xc5   : > { %v1073_v10 = vpop.eup %1072  ;;  %v323_v11 = vmul.f32 %v1071_v8, %v1354_v24 }
  0xc6   : > { %994 = vmatpush3.bf16.msra.mxu1 %v991_v4  ;;  %v322_v12 = vmul.f32 %v1073_v10, %v1356_v25 }
  0xc7   : > { %931 = vmatmul.mubr.f32.gmra.mrb[4].mxu0 %v321_v6  ;;  %996 = vmatprep.subr.bf16.mxu1 %v995_v9  ;;  %331 = vst [vmem:[%s1395_s29 + $0x38] sm:$0xff] %v323_v11 }
  0xc8   : > { %933 = vmatprep.mubr.f32.mxu0 %v322_v12  ;;  %v999_v13 = vpack.c.bf16 %v323_v11, %v322_v12  ;;  %330 = vst [vmem:[%s1395_s29 + $0x30] sm:$0xff] %v322_v12 }
  0xca   : > { %998 = vmatpush3.bf16.msra.mxu1 %v995_v9 }
  0xcb   : > { %934 = vmatmul.mubr.f32.gmra.mrb[6].mxu0 %v323_v11  ;;  %1000 = vmatprep.subr.bf16.mxu1 %v999_v13 }
  0xce   : > { %1002 = vmatpush3.bf16.msra.mxu1 %v999_v13 }
 0x13e   : > { %v493_v24 = vpop.permute.xlu0 %492 }
 0x192   : > { %v926_v15 = vpop.f32.mrb[0].mxu0 }
 0x193   : > { %v414_v16 = vpop.f32.mrb[1].mxu0 }
 0x194   : > { %453 = vxpose.xlu1.b32.start [1/8] (short) (narrow) %v414_v16, 16 }
 0x196   : > { %v929_v17 = vpop.f32.mrb[2].mxu0 }
 0x197   : > { %v424_v18 = vpop.f32.mrb[3].mxu0 }
 0x198   : > { %454 = vxpose.xlu1.b32.cont [2/8] (short) (narrow) %v926_v15, 16 }
 0x19a   : > { %v932_v19 = vpop.f32.mrb[4].mxu0 }
 0x19b   : > { %v434_v20 = vpop.f32.mrb[5].mxu0 }
 0x19c   : > { %455 = vxpose.xlu1.b32.cont [3/8] (short) (narrow) %v424_v18, 16 }
 0x19e   : > { %v935_v21 = vpop.f32.mrb[6].mxu0 }
 0x19f   : > { %v444_v22 = vpop.f32.mrb[7].mxu0 }
 0x1a0   : > { %456 = vxpose.xlu1.b32.cont [4/8] (short) (narrow) %v929_v17, 16 }
 0x1a4   : > { %457 = vxpose.xlu1.b32.cont [5/8] (short) (narrow) %v434_v20, 16 }
 0x1a8   : > { %458 = vxpose.xlu1.b32.cont [6/8] (short) (narrow) %v932_v19, 16 }
 0x1ac   : > { %459 = vxpose.xlu1.b32.cont [7/8] (short) (narrow) %v444_v22, 16 }
 0x1b0   : > { %460 = vxpose.xlu1.b32.end [8/8] (short) (narrow) %v935_v21, 16 }
 0x214   : > { %v469_v25 = vpop.trf.xlu1 }
 0x215   : > { %486 = vst.msk [vmem:[%s1417_s12] sm:$0xff] %vm485_vm0, %v469_v25  ;;  %v500_v26 = vadd.f32 %v493_v24, %v469_v25 }
 0x217   : > { %v502_v28 = vmul.f32 50.0, %v500_v26 }
 0x218   : > { %v470_v27 = vpop.trf.xlu1 }
 0x219   : > { %487 = vst.msk [vmem:[%s1417_s12 + $0x8] sm:$0xff] %vm485_vm0, %v470_v27  ;;  %v501_v29 = vadd.f32 %v498_v23, %v470_v27  ;;  %v504_v31 = vsel %vm485_vm0, %v502_v28, -inf  ;;  %s1211_s12 = smov [#allocation4]  }
 0x21a   : > { %s1090_s15 = sshll.u32 %s1211_s12, 4  ;;  %s1091_s15 = int_to_ptr.vmem [resolvable:$false] %s1090_s15 }
 0x21b   : > { %v503_v30 = vmul.f32 50.0, %v501_v29  ;;  %s1092_s16 = scalar_lea.vmem %s1091_s15, 512  ;;  %p1093_p0 = scmp.lt.s32.totalorder %s1446_s17, %s1091_s15 }
 0x21c   : > { %p1094_p1 = scmp.lt.s32.totalorder %s1092_s16, %s1086_s14 }
 0x21d   : > { %v505_v32 = vsel %vm485_vm0, %v503_v30, -inf }
 0x21e   : > { %v506_v33 = vmax.f32 %v504_v31, %v505_v32  ;;  %p1095_p2 = por %p1094_p1, %p1093_p0 }
 0x220   : > { %v507_v34 = vrot.slane %v506_v33, 4  ;;  %p1096_p3 = pnand %p1095_p2, %p1089_p13 }
 0x222   : > { %v508_v35 = vmax.f32 %v506_v33, %v507_v34 }
 0x224   : > { %v509_v36 = vrot.slane %v508_v35, 2 }
 0x226   : > { %v510_v37 = vmax.f32 %v508_v35, %v509_v36 }
 0x228   : > { %v511_v38 = vrot.slane %v510_v37, 1 }
 0x22a   : > { %v512_v39 = vmax.f32 %v510_v37, %v511_v38 }
 0x22c   : > { %v513_v40 = vsub.f32 %v502_v28, %v512_v39  ;;  %v514_v41 = vsub.f32 %v503_v30, %v512_v39 }
 0x22e   : > { %v515_v42 = vmul.f32 1.442695, %v513_v40  ;;  %v517_v43 = vmul.f32 1.442695, %v514_v41 }
 0x230   : > { %1074 = vpow2.f32 %v515_v42 }
 0x231   : > { %1076 = vpow2.f32 %v517_v43 }
 0x23a   : > { %v1075_v44 = vpop.eup %1074 }
 0x23b   : > { %v1077_v45 = vpop.eup %1076  ;;  %v519_v46 = vsel %vm485_vm0, %v1075_v44, 0.0 }
 0x23c   : > { %v520_v47 = vsel %vm485_vm0, %v1077_v45, 0.0 }
 0x23d   : > { %v521_v48 = vadd.f32 %v520_v47, %v519_v46 }
 0x23f   : > { %v522_v49 = vrot.slane %v521_v48, 4 }
 0x241   : > { %v523_v50 = vadd.f32 %v522_v49, %v521_v48 }
 0x243   : > { %v524_v51 = vrot.slane %v523_v50, 2 }
 0x245   : > { %v525_v52 = vadd.f32 %v524_v51, %v523_v50 }
 0x247   : > { %v526_v53 = vrot.slane %v525_v52, 1 }
 0x249   : > { %v527_v54 = vadd.f32 %v526_v53, %v525_v52 }
 0x24b   : > { %1078 = vrcp.f32 %v527_v54 }
 0x255   : > { %v1079_v55 = vpop.eup %1078 }
 0x256   : > { %v529_v56 = vmul.f32 %v1079_v55, %v1075_v44  ;;  %v530_v57 = vmul.f32 %v1079_v55, %v1077_v45 }
 0x258   : > { %952 = vmatprep.mubr.msk.f32.mxu1 %vm485_vm0, %v529_v56  ;;  %v612_v58 = vsel %vm485_vm0, %v529_v56, 0.0  ;;  %v615_v59 = vsel %vm485_vm0, %v530_v57, 0.0 }
 0x259   : > { %613 = vadd.xlane.f32.xlu0 %v612_v58  ;;  %953 = vmatmul.mubr.msk.f32.vlgmr.msra.gmra.mrb[0].mxu1 %vm485_vm0, %v530_v57 }
 0x25d   : > { %616 = vadd.xlane.f32.xlu0 %v615_v59 }
 0x2e6   : > { %v614_v60 = vpop.xlane.xlu0 %613 }
 0x2e7   : > { %v620_v0 = vmul.f32 %v618_v61, %v614_v60 }
 0x2ea   : > { %v617_v63 = vpop.xlane.xlu0 %616 }
 0x2eb   : > { %v621_v3 = vmul.f32 %v619_v62, %v617_v63 }
 0x32c   : > { %v954_v1 = vpop.f32.mrb[0].mxu1 }
 0x32d   : > { %v603_v2 = vpop.f32.mrb[1].mxu1  ;;  %v1439_v5 = vsub.f32 %v954_v1, %v621_v3 }
 0x32e   : > { %v1437_v4 = vsub.f32 %v603_v2, %v620_v0 }
 0x32f   : > { %v625_v7 = vmul.f32 %v1439_v5, %v1439_v5 }
 0x330   : > { %v624_v6 = vmul.f32 %v1437_v4, %v1437_v4 }
 0x332   : > { %626 = vadd.xlane.f32.xlu0 %v624_v6 }
 0x336   : > { %628 = vadd.xlane.f32.xlu0 %v625_v7 }
 0x337   : > { %1099 = shalt.err (!%p1096_p3)
}
 0x338   : > { %s1100_s18 = scalar_lea.hbm %s1455_s10, 256  ;;  %s1104_s12 = scalar_lea.hbm %s1582_s5, 512 }
 0x339   : > { %p1101_p4 = scmp.ne.s32.totalorder %s1455_s10, %s1100_s18  ;;  %p1105_p9 = scmp.lt.u32.totalorder %s1455_s10, %s1582_s5 }
 0x33a   : > { %p1106_p10 = scmp.lt.u32.totalorder %s1104_s12, %s1100_s18  ;;  %p1108_p12 = scmp.lt.u32.totalorder %s1100_s18, %s1455_s10 }
 0x33b   : > { %p1102_p7 = pnand %p1101_p4, %p1291_p5 }
 0x33c   : > { %p1107_p11 = por %p1106_p10, %p1105_p9 }
 0x33d   : > { %p1103_p8 = pneg %p1102_p7 }
 0x33e   : > { %p1109_p13 = por %p1108_p12, %p1107_p11 }
 0x340   : > { %p1110_p0 = pnand %p1109_p13, %p1103_p8 }
 0x342   : > { %1113 = shalt.err (!%p1110_p0)
}
 0x343   : > { %s1212_s14 = smov 128   ;;  %s1213_s16 = smov 8  }
 0x344   : > { %1004 = dma.vmem_to_hbm [thread:$0]  (%p1291_p5), %s1446_s17, 256, %s1455_s10, %s1457_s13, %s1212_s14, %s1212_s14, %s1213_s16  }
 0x345   : > { %s709_s26 = sshll.u32 %s1395_s29, 4  ;;  %s857_s18 = sshll.u32 %s1272_s25, 10  ;;  %s1485_s26 = int_to_ptr.vmem [resolvable:$true] %s709_s26 }
 0x346   : > { %s1491_s12 = scalar_lea.hbm %s1583_s6, %s857_s18  ;;  %s1114_s15 = scalar_lea.vmem %s1485_s26, 1024 }
 0x347   : > { %p1115_p1 = scmp.ne.s32.totalorder %s1485_s26, %s1114_s15  ;;  %s1214_s19 = smov [#allocation6]  }
 0x348   : > { %s1118_s11 = sshll.u32 %s1214_s19, 4  ;;  %s1119_s11 = int_to_ptr.vmem [resolvable:$false] %s1118_s11 }
 0x349   : > { %p1116_p2 = pnand %p1115_p1, %p1291_p5  ;;  %s1120_s29 = scalar_lea.vmem %s1119_s11, 2048 }
 0x34a   : > { %p1121_p4 = scmp.lt.s32.totalorder %s1485_s26, %s1119_s11  ;;  %p1122_p7 = scmp.lt.s32.totalorder %s1120_s29, %s1114_s15 }
 0x34b   : > { %p1117_p3 = pneg %p1116_p2 }
 0x34c   : > { %p1123_p8 = por %p1122_p7, %p1121_p4 }
 0x34e   : > { %p1124_p9 = pnand %p1123_p8, %p1117_p3 }
 0x350   : > { %1127 = shalt.err (!%p1124_p9)
}
 0x351   : > { %s1128_s17 = scalar_lea.hbm %s1491_s12, 1024  ;;  %s1132_s19 = scalar_lea.hbm %s1583_s6, 2048 }
 0x352   : > { %p1129_p10 = scmp.ne.s32.totalorder %s1491_s12, %s1128_s17  ;;  %p1133_p13 = scmp.lt.u32.totalorder %s1491_s12, %s1583_s6 }
 0x353   : > { %p1134_p0 = scmp.lt.u32.totalorder %s1132_s19, %s1128_s17  ;;  %p1136_p2 = scmp.lt.u32.totalorder %s1128_s17, %s1491_s12 }
 0x354   : > { %p1130_p11 = pnand %p1129_p10, %p1291_p5 }
 0x355   : > { %p1135_p1 = por %p1134_p0, %p1133_p13 }
 0x356   : > { %p1131_p12 = pneg %p1130_p11 }
 0x357   : > { %p1137_p3 = por %p1136_p2, %p1135_p1 }
 0x359   : > { %p1138_p4 = pnand %p1137_p3, %p1131_p12 }
 0x35b   : > { %1141 = shalt.err (!%p1138_p4)
}
 0x35c   : > { %1005 = dma.vmem_to_hbm [thread:$0]  (%p1291_p5), %s1485_s26, 1024, %s1491_s12, %s1457_s13, %s1212_s14, %s1212_s14, %s1213_s16  }
 0x35d   : > { %s1589_s13 = sshll.u32 %s1390_s20, 4  ;;  %s1590_s12 = sshll.u32 %s1272_s25, 8 }
 0x35e   : > { %s248_s26 = scalar_lea.vmem [#allocation2], %s1589_s13  ;;  %s1529_s17 = scalar_lea.hbm %s1581_s4, %s1590_s12 }
 0x35f   : > { %s677_s9 = sshll.u32 %s248_s26, 4  ;;  %s654_s10 = scalar_lea.sflag [#allocation3], %s1390_s20  ;;  %s1522_s9 = int_to_ptr.vmem [resolvable:$true] %s677_s9 }
 0x360   : > { %s1142_s18 = scalar_lea.vmem %s1522_s9, 256  ;;  %s1215_s19 = smov [#allocation2]  }
 0x361   : > { %p1143_p7 = scmp.ne.s32.totalorder %s1522_s9, %s1142_s18  ;;  %s1146_s28 = sshll.u32 %s1215_s19, 4  ;;  %s1147_s28 = int_to_ptr.vmem [resolvable:$false] %s1146_s28 }
 0x362   : > { %s1148_s11 = scalar_lea.vmem %s1147_s28, 512  ;;  %p1149_p10 = scmp.lt.s32.totalorder %s1522_s9, %s1147_s28 }
 0x363   : > { %p1144_p8 = pnand %p1143_p7, %p1291_p5  ;;  %p1150_p11 = scmp.lt.s32.totalorder %s1148_s11, %s1142_s18 }
 0x365   : > { %p1145_p9 = pneg %p1144_p8  ;;  %p1151_p12 = por %p1150_p11, %p1149_p10 }
 0x367   : > { %p1152_p13 = pnand %p1151_p12, %p1145_p9 }
 0x3bf   : > { %v627_v8 = vpop.xlane.xlu0 %626 }
 0x3c0   : > { %v636_v9 = vmul.f32 1e+24, %v627_v8  ;;  %v630_v18 = vmax.f32 %v627_v8, 1e-24 }
 0x3c2   : > { %v638_v12 = vmin.f32 %v636_v9, 1.0  ;;  %1080 = vrsqrt.f32 %v630_v18 }
 0x3c3   : > { %v629_v10 = vpop.xlane.xlu0 %628 }
 0x3c4   : > { %v637_v11 = vmul.f32 1e+24, %v629_v10  ;;  %v631_v19 = vmax.f32 %v629_v10, 1e-24 }
 0x3c6   : > { %v639_v13 = vmin.f32 %v637_v11, 1.0  ;;  %1082 = vrsqrt.f32 %v631_v19 }
 0x3c8   : > { %v640_v14 = vadd.f32 %v639_v13, %v638_v12 }
 0x3ca   : > { %v641_v15 = vrot.slane %v640_v14, 4 }
 0x3cc   : > { %v642_v16 = vadd.f32 %v641_v15, %v640_v14  ;;  %v1081_v24 = vpop.eup %1080 }
 0x3cd   : > { %v634_v26 = vmul.f32 %v1081_v24, %v1437_v4 }
 0x3ce   : > { %v643_v17 = vrot.slane %v642_v16, 2 }
 0x3d0   : > { %v644_v20 = vadd.f32 %v643_v17, %v642_v16  ;;  %v1083_v25 = vpop.eup %1082 }
 0x3d1   : > { %v635_v27 = vmul.f32 %v1083_v25, %v1439_v5 }
 0x3d2   : > { %v645_v21 = vrot.slane %v644_v20, 1 }
 0x3d4   : > { %v646_v22 = vadd.f32 %v645_v21, %v644_v20 }
 0x3d6   : > { %v647_v23 = vmax.f32 %v646_v22, 1e-24 }
 0x3d8   : > { %1084 = vrsqrt.f32 %v647_v23 }
 0x3e2   : > { %v1085_v28 = vpop.eup %1084 }
 0x3e3   : > { %v649_v29 = vmul.f32 %v1085_v28, %v634_v26  ;;  %v650_v30 = vmul.f32 %v1085_v28, %v635_v27 }
 0x3e5   : > { %651 = vst [vmem:[%s248_s26] sm:$0xff] %v649_v29  ;;  %652 = vst [vmem:[%s248_s26 + $0x8] sm:$0xff] %v650_v30 }
 0x3e6   : > { %1155 = shalt.err (!%p1152_p13)
}
 0x3e7   : > { %s1156_s25 = scalar_lea.hbm %s1529_s17, 256  ;;  %s1160_s12 = scalar_lea.hbm %s1581_s4, 512 }
 0x3e8   : > { %p1157_p0 = scmp.ne.s32.totalorder %s1529_s17, %s1156_s25  ;;  %p1161_p3 = scmp.lt.u32.totalorder %s1529_s17, %s1581_s4 }
 0x3e9   : > { %p1162_p4 = scmp.lt.u32.totalorder %s1160_s12, %s1156_s25  ;;  %p1164_p8 = scmp.lt.u32.totalorder %s1156_s25, %s1529_s17 }
 0x3ea   : > { %p1158_p1 = pnand %p1157_p0, %p1291_p5 }
 0x3eb   : > { %p1163_p7 = por %p1162_p4, %p1161_p3 }
 0x3ec   : > { %p1159_p2 = pneg %p1158_p1 }
 0x3ed   : > { %p1165_p9 = por %p1164_p8, %p1163_p7 }
 0x3ef   : > { %p1166_p10 = pnand %p1165_p9, %p1159_p2 }
 0x3f1   : > { %1169 = shalt.err (!%p1166_p10)
}
 0x3f2   : > { %1003 = dma.vmem_to_hbm [thread:$0]  (%p1291_p5), %s1522_s9, 256, %s1529_s17, %s654_s10, %s1212_s14, %s1212_s14, %s1213_s16  }
 0x3f3 PF: > { %p1019_p11 = scmp.ge.s32.totalorder %s1208_s24, 2  ;;  %s724_s18 = sand.u32 1, %s1196_s21  }
 0x3f4   : > { %s725_s19 = scalar_lea.sflag [#allocation3], %s724_s18 }
 0x3f5   : > { %p1010_p12 = pnand %p1019_p11, %p1295_p6 }
 0x3f7   : > { %1187 = dma.done.wait (!%p1010_p12), %s725_s19, 256  }
 0x3f8   : > { %1189 = vsyncadd (!%p1010_p12), %s725_s19, 4294967040  ;;  %s1591_s7 = sadd.s32 4294967294, %s1208_s24  }
 0x3f9   : > { %s733_s28 = sand.u32 1, %s1591_s7  }
 0x3fa   : > { %s734_s11 = scalar_lea.sflag [#allocation5], %s733_s28 }
 0x3fb   : > { %1191 = dma.done.wait (!%p1010_p12), %s734_s11, 1280  }
 0x3fc   : > { %1193 = vsyncadd (!%p1010_p12), %s734_s11, 4294966016  ;;  %p20_p5 = scmp.ge.s32.totalorder %s1276_s27, 4   ;;  %s1592_s21 = smov %s1200_s22 }
 0x3fd   : > { %s1593_s22 = smov %s1204_s23  ;;  %s1594_s23 = smov %s1289_s30 }
 0x3fe   : > { %s1595_s24 = smov %s1276_s27  ;;  %22 = sbr.rel (!%p20_p5) target bundleno = 5 (0x5), region = 103 }
 0x405   :  { %748 = vsyncpa [#allocation3], 1 }
 0x406   :  { %750 = vsyncpa [#allocation3 + $0x1], 1 }
 0x407   :  { %751 = vsyncpa [#allocation5], 1 }
 0x408   :  { %753 = vsyncpa [#allocation5 + $0x1], 1 }

</bundles_post_ra>
